<compile_context>
chip_gen: v7x
topology: tpu7x:2x2x1
jax: 0.10.0
libtpu: 0.0.40
codegen_flags: <defaults>
</compile_context>

<pallas_src>
import functools

import jax
import jax.numpy as jnp
from jax import lax
from jax.experimental import pallas as pl
from jax.experimental.pallas import tpu as pltpu


def _round_up(x: int, m: int) -> int:
    return ((x + m - 1) // m) * m


def _tpu_vmem_capacity_bytes() -> int:
    try:
        cap = getattr(pltpu.get_tpu_info(), "vmem_capacity_bytes", None)
        if cap:
            return int(cap)
    except Exception:
        pass
    return 64 * 1024 * 1024  # conservative (v7x-sized) default


def _detect_num_tensorcores() -> int:
    # v7x exposes 2 TensorCores per chip; v5e/v6e have 1.
    try:
        kind = jax.devices()[0].device_kind.lower()
    except Exception:
        return 1
    if "v7" in kind or "tpu7" in kind:
        return 2
    return 1


def _auto_tiles(total, itemsize, sub, target_block_bytes, k_cap=2048):
    """Pick (tile_k, tile_rows). Prefers pad-free factorizations of `total`."""
    k_hi = min(k_cap, _round_up(total, 128))
    for tk in range(k_hi, 127, -128):
        if total % tk:
            continue
        rows = total // tk
        target_rows = max(sub, (target_block_bytes // (tk * itemsize)) // sub * sub)
        if rows <= target_rows:
            return tk, rows                       # single row-block, pad == 0
        # Largest multiple-of-`sub` divisor of rows near the target block size.
        tr_min = max(sub, ((target_rows // 8) // sub) * sub)
        tr = target_rows
        while tr >= tr_min:
            if rows % tr == 0:
                return tk, tr                     # multi-block, pad == 0
            tr -= sub
    # Padded fallback (wrapper zero-pads; padded error == 0 -> loss unchanged).
    tk = min(k_cap, _round_up(total, 128))
    rows_needed = -(-total // tk)
    target_rows = max(sub, (target_block_bytes // (tk * itemsize)) // sub * sub)
    tr = min(target_rows, _round_up(rows_needed, sub))
    return tk, tr


def _lossi_kernel(preds_ref, labels_ref, out_ref, acc_ref, *,
                  epsilon1, epsilon2, delta, inv_n, chunk_rows):
    i = pl.program_id(1)

    @pl.when(i == 0)
    def _init():
        acc_ref[...] = jnp.zeros_like(acc_ref)

    tile_rows, tile_k = preds_ref.shape
    w_hi = jnp.float32(delta)
    w_lo = jnp.float32(1.0 - delta)

    def accum(p_raw, l_raw):
        # Upcast to f32; compare/weight/square in f32 (matches the reference).
        # TODO(synk): with bf16 wire dtype on v7x the kernel tips VALU-bound;
        # comparing the raw bf16 labels before the upcast would trim VPU work.
        p = p_raw.astype(jnp.float32)
        l = l_raw.astype(jnp.float32)
        err = p - l
        mask = jnp.logical_or(l >= epsilon2, l <= epsilon1)
        # Fused weighting: mask*(1-mask)==0 makes this exactly equal to
        # delta*(mask*err)^2 + (1-delta)*((1-mask)*err)^2 summed.
        wse = jnp.where(mask, w_hi, w_lo) * err * err
        cr = wse.shape[0]
        if cr % 8 == 0:
            # Leading-axis sum over 8-row groups: layout-preserving reshape +
            # VPU adds only; no per-chunk cross-lane XLU reduce.
            acc_ref[...] = acc_ref[...] + jnp.sum(
                wse.reshape(cr // 8, 8, tile_k), axis=0)
        else:
            # Tiny full-block case (rows < 8): fold into accumulator row 0.
            acc_ref[0:1, :] = acc_ref[0:1, :] + jnp.sum(
                wse, axis=0, keepdims=True)

    num_chunks = tile_rows // chunk_rows
    rem = tile_rows - num_chunks * chunk_rows

    if num_chunks == 1 and rem == 0:
        accum(preds_ref[...], labels_ref[...])
    else:
        def body(c, carry):
            r0 = pl.multiple_of(c * chunk_rows, chunk_rows)
            accum(preds_ref[pl.ds(r0, chunk_rows), :],
                  labels_ref[pl.ds(r0, chunk_rows), :])
            return carry
        lax.fori_loop(0, num_chunks, body, 0, unroll=(num_chunks <= 8))
        if rem:
            r0 = num_chunks * chunk_rows
            accum(preds_ref[pl.ds(r0, rem), :],
                  labels_ref[pl.ds(r0, rem), :])

    @pl.when(i == pl.num_programs(1) - 1)
    def _finalize():
        out_ref[0, 0] = jnp.sum(acc_ref[...]) * inv_n


def lossi(preds, labels, *, epsilon1, epsilon2, delta,
          tile_rows=None, tile_k=None, num_cores=None):
    """Pallas TPU version of LossI.forward. preds/labels: NCHW arrays."""
    assert preds.shape == labels.shape
    n = preds.shape[0]
    total = preds.size
    itemsize = jnp.dtype(preds.dtype).itemsize
    # Sublane multiple for the wire dtype: 8 (f32) / 16 (bf16) / 32 (int8/fp8).
    sub = max(8, 8 * (4 // itemsize))

    vmem_cap = _tpu_vmem_capacity_bytes()
    # Generation-aware per-input block size: big on 128 MiB VMEM (v5e/v6e),
    # capped on 64 MiB VMEM (v7x).
    target_block_bytes = (8 << 20) if vmem_cap >= (96 << 20) else (4 << 20)

    if tile_k is not None and tile_rows is not None:
        tk, tr = int(tile_k), int(tile_rows)
    else:
        tk, tr = _auto_tiles(total, itemsize, sub, target_block_bytes)

    rows_needed = -(-total // tk)
    rows_padded = _round_up(rows_needed, tr)
    padded_total = rows_padded * tk
    num_blocks = rows_padded // tr

    # Zero-pad only when the pad-free factorization is impossible (ragged
    # sizes); the auto-tiler keeps pad == 0 for divisible-by-128 totals so no
    # extra HBM copy is made on the hot path.
    pad = padded_total - total
    if pad:
        p2 = jnp.pad(preds.reshape(-1), (0, pad)).reshape(rows_padded, tk)
        l2 = jnp.pad(labels.reshape(-1), (0, pad)).reshape(rows_padded, tk)
    else:
        p2 = preds.reshape(rows_padded, tk)
        l2 = labels.reshape(rows_padded, tk)

    # Optional v7x 2-TensorCore split: each core streams half the row blocks
    # into its own accumulator/partial; partials are summed in the wrapper.
    cores = _detect_num_tensorcores() if num_cores is None else int(num_cores)
    if cores < 1 or num_blocks % cores != 0:
        cores = 1
    blocks_per_core = num_blocks // cores
    if cores > 1:
        dim_sems = (pltpu.CORE_PARALLEL, pltpu.ARBITRARY)
    else:
        dim_sems = ("arbitrary", "arbitrary")

    # In-kernel row-chunking: keep f32 temporaries around ~1 MiB so they never
    # compete with the double-buffered input blocks in VMEM.
    chunk_rows = min(tr, max(sub, ((1 << 20) // (tk * 4)) // sub * sub))

    kernel = functools.partial(
        _lossi_kernel,
        epsilon1=float(epsilon1),
        epsilon2=float(epsilon2),
        delta=float(delta),
        inv_n=1.0 / float(n),
        chunk_rows=chunk_rows,
    )

    # VMEM limit from actual footprint (2 inputs x 2 pipeline buffers x block
    # + accumulator) with ~50% headroom, clipped to 3/4 of physical VMEM.
    block_bytes = tr * tk * itemsize
    footprint = 2 * 2 * block_bytes + 8 * tk * 4 + (64 << 10)
    vmem_limit = min(max(int(footprint * 1.5), 8 << 20), (vmem_cap * 3) // 4)

    cost = pl.CostEstimate(
        flops=8 * padded_total,            # sub, 2 cmp, or, select, 2 mul, add
        transcendentals=0,
        bytes_accessed=2 * padded_total * itemsize + 4 * cores,
    )

    in_map = lambda c, i: (c * blocks_per_core + i, 0)
    partials = pl.pallas_call(
        kernel,
        out_shape=jax.ShapeDtypeStruct((cores, 1), jnp.float32),
        grid_spec=pltpu.PrefetchScalarGridSpec(
            num_scalar_prefetch=0,
            grid=(cores, blocks_per_core),
            in_specs=[
                pl.BlockSpec((tr, tk), in_map),
                pl.BlockSpec((tr, tk), in_map),
            ],
            out_specs=pl.BlockSpec((1, 1), lambda c, i: (c, 0),
                                   memory_space=pltpu.SMEM),
            scratch_shapes=[pltpu.VMEM((8, tk), jnp.float32)],
        ),
        compiler_params=pltpu.CompilerParams(
            dimension_semantics=dim_sems,
            vmem_limit_bytes=vmem_limit,
        ),
        cost_estimate=cost,
    )(p2, l2)
    # Each per-core partial is already scaled by 1/N; their sum is the loss.
    return jnp.sum(partials)


def _lossi_ref(preds, labels, *, epsilon1, epsilon2, delta):
    """Pure-JAX reference mirroring the PyTorch forward exactly."""
    preds = preds.astype(jnp.float32)
    labels = labels.astype(jnp.float32)
    error = preds - labels
    mask = jnp.logical_or(labels >= epsilon2, labels <= epsilon1)
    mask_f = mask.astype(jnp.float32)
    s1 = jnp.sum(jnp.square(mask_f * error))
    s2 = jnp.sum(jnp.square((1.0 - mask_f) * error))
    return (delta * s1 + (1.0 - delta) * s2) / preds.shape[0]


if __name__ == "__main__":
    # LossI has no learnable parameters; only scalar hyperparameters.
    epsilon1, epsilon2, delta = -0.5, 0.5, 0.7

    key = jax.random.PRNGKey(0)
    k1, k2, k3, k4, k5, k6 = jax.random.split(key, 6)

    # 1) Main small NCHW example (pad-free auto tiling, single block).
    preds = jax.random.normal(k1, (2, 4, 16, 16), dtype=jnp.float32)
    labels = jax.random.normal(k2, (2, 4, 16, 16), dtype=jnp.float32)
    out = lossi(preds, labels, epsilon1=epsilon1, epsilon2=epsilon2, delta=delta)
    out = jax.block_until_ready(out)
    ref = _lossi_ref(preds, labels, epsilon1=epsilon1, epsilon2=epsilon2, delta=delta)
    assert jnp.allclose(out, ref, rtol=1e-5, atol=1e-5), (out, ref)

    # 2) Forced multi-block grid: exercises the accumulator init / accumulate /
    #    finalize path across several pipelined steps (still pad-free).
    preds2 = jax.random.normal(k3, (2, 8, 32, 32), dtype=jnp.float32)
    labels2 = jax.random.normal(k4, (2, 8, 32, 32), dtype=jnp.float32)
    out2 = lossi(preds2, labels2, epsilon1=epsilon1, epsilon2=epsilon2,
                 delta=delta, tile_rows=8, tile_k=1024)
    out2 = jax.block_until_ready(out2)
    ref2 = _lossi_ref(preds2, labels2, epsilon1=epsilon1, epsilon2=epsilon2,
                      delta=delta)
    assert jnp.allclose(out2, ref2, rtol=1e-5, atol=1e-5), (out2, ref2)

    # 3) Ragged total (not a multiple of 128): exercises the padded fallback.
    preds3 = jax.random.normal(k5, (3, 3, 5, 7), dtype=jnp.float32)
    labels3 = jax.random.normal(k6, (3, 3, 5, 7), dtype=jnp.float32)
    out3 = lossi(preds3, labels3, epsilon1=epsilon1, epsilon2=epsilon2, delta=delta)
    out3 = jax.block_until_ready(out3)
    ref3 = _lossi_ref(preds3, labels3, epsilon1=epsilon1, epsilon2=epsilon2,
                      delta=delta)
    assert jnp.allclose(out3, ref3, rtol=1e-5, atol=1e-5), (out3, ref3)

    print("KERNEL_OK")
</pallas_src>

<mosaic_0001>
module attributes {stable_mosaic.version = 11 : i64} {
  func.func @_lossi_kernel(%arg0: i32, %arg1: i32, %arg2: memref<1x2048xf32, #tpu.memory_space<vmem>>, %arg3: memref<1x2048xf32, #tpu.memory_space<vmem>>, %arg4: memref<1x1xf32, #tpu.memory_space<smem>>, %arg5: memref<8x2048xf32, #tpu.memory_space<vmem>>) attributes {dimension_semantics = [#tpu.dimension_semantics<arbitrary>, #tpu.dimension_semantics<arbitrary>], iteration_bounds = array<i64: 1, 1>, scalar_prefetch = 0 : i64, scratch_operands = 1 : i64, tpu.core_type = #tpu.core_type<tc>, window_params = [{transform_indices = @transform_0, window_bounds = array<i64: 1, 2048>}, {transform_indices = @transform_1, window_bounds = array<i64: 1, 2048>}, {transform_indices = @transform_2, window_bounds = array<i64: 1, 1>}]} {
    %c0_i32 = arith.constant 0 : i32
    %0 = arith.cmpi eq, %arg1, %c0_i32 : i32
    %1 = arith.extui %0 : i1 to i32
    %c0_i32_0 = arith.constant 0 : i32
    %2 = arith.cmpi ne, %1, %c0_i32_0 : i32
    scf.if %2 {
      %cst_14 = arith.constant 0.000000e+00 : f32
      %24 = vector.broadcast %cst_14 : f32 to vector<8x2048xf32>
      %c0_15 = arith.constant 0 : index
      %c0_16 = arith.constant 0 : index
      %25 = vector.load %arg5[%c0_15, %c0_16] : memref<8x2048xf32, #tpu.memory_space<vmem>>, vector<8x2048xf32>
      tpu.vector_store %arg5[%c0_15, %c0_16], %24 {strides = array<i32>} : memref<8x2048xf32, #tpu.memory_space<vmem>>, vector<8x2048xf32>,
    } else {
    }
    %c0 = arith.constant 0 : index
    %c0_1 = arith.constant 0 : index
    %3 = vector.load %arg2[%c0, %c0_1] : memref<1x2048xf32, #tpu.memory_space<vmem>>, vector<1x2048xf32>
    %c0_2 = arith.constant 0 : index
    %c0_3 = arith.constant 0 : index
    %4 = vector.load %arg3[%c0_2, %c0_3] : memref<1x2048xf32, #tpu.memory_space<vmem>>, vector<1x2048xf32>
    %5 = arith.subf %3, %4 : vector<1x2048xf32>
    %cst = arith.constant 5.000000e-01 : f32
    %6 = vector.broadcast %cst : f32 to vector<1x2048xf32>
    %7 = arith.cmpf oge, %4, %6 : vector<1x2048xf32>
    %cst_4 = arith.constant -5.000000e-01 : f32
    %8 = vector.broadcast %cst_4 : f32 to vector<1x2048xf32>
    %9 = arith.cmpf ole, %4, %8 : vector<1x2048xf32>
    %10 = arith.ori %7, %9 : vector<1x2048xi1>
    %cst_5 = arith.constant 0.699999988 : f32
    %cst_6 = arith.constant 3.000000e-01 : f32
    %11 = vector.broadcast %cst_5 : f32 to vector<1x2048xf32>
    %12 = vector.broadcast %cst_6 : f32 to vector<1x2048xf32>
    %13 = arith.select %10, %11, %12 : vector<1x2048xi1>, vector<1x2048xf32>
    %14 = arith.mulf %13, %5 : vector<1x2048xf32>
    %15 = arith.mulf %14, %5 : vector<1x2048xf32>
    %c0_7 = arith.constant 0 : index
    %c0_8 = arith.constant 0 : index
    %16 = vector.load %arg5[%c0_7, %c0_8] : memref<8x2048xf32, #tpu.memory_space<vmem>>, vector<1x2048xf32>
    %cst_9 = arith.constant dense<0.000000e+00> : vector<2048xf32>
    %17 = vector.multi_reduction <add>, %15, %cst_9 [0] : vector<1x2048xf32> to vector<2048xf32>
    %18 = vector.shape_cast %17 : vector<2048xf32> to vector<1x2048xf32>
    %19 = arith.addf %16, %18 : vector<1x2048xf32>
    %c0_10 = arith.constant 0 : index
    %c0_11 = arith.constant 0 : index
    %20 = vector.load %arg5[%c0_10, %c0_11] : memref<8x2048xf32, #tpu.memory_space<vmem>>, vector<1x2048xf32>
    tpu.vector_store %arg5[%c0_10, %c0_11], %19 {strides = array<i32>} : memref<8x2048xf32, #tpu.memory_space<vmem>>, vector<1x2048xf32>,
    %c0_i32_12 = arith.constant 0 : i32
    %21 = arith.cmpi eq, %arg1, %c0_i32_12 : i32
    %22 = arith.extui %21 : i1 to i32
    %c0_i32_13 = arith.constant 0 : i32
    %23 = arith.cmpi ne, %22, %c0_i32_13 : i32
    scf.if %23 {
      %c0_14 = arith.constant 0 : index
      %c0_15 = arith.constant 0 : index
      %24 = vector.load %arg5[%c0_14, %c0_15] : memref<8x2048xf32, #tpu.memory_space<vmem>>, vector<8x2048xf32>
      %25 = vector.shape_cast %24 : vector<8x2048xf32> to vector<1x8x2048xf32>
      %cst_16 = arith.constant dense<0.000000e+00> : vector<1xf32>
      %26 = vector.multi_reduction <add>, %25, %cst_16 [1, 2] : vector<1x8x2048xf32> to vector<1xf32>
      %27 = vector.shape_cast %26 : vector<1xf32> to vector<1x1x1xf32>
      %28 = vector.extract %27[0, 0, 0] : f32 from vector<1x1x1xf32>
      %cst_17 = arith.constant 5.000000e-01 : f32
      %29 = arith.mulf %28, %cst_17 : f32
      %c0_18 = arith.constant 0 : index
      %c0_19 = arith.constant 0 : index
      %30 = memref.load %arg4[%c0_18, %c0_19] : memref<1x1xf32, #tpu.memory_space<smem>>
      memref.store %29, %arg4[%c0_18, %c0_19] : memref<1x1xf32, #tpu.memory_space<smem>>
    } else {
    }
    return
  }
  func.func @transform_0(%arg0: i32, %arg1: i32) -> (i32, i32) {
    %c1_i32 = arith.constant 1 : i32
    %0 = arith.muli %arg0, %c1_i32 : i32
    %1 = arith.addi %0, %arg1 : i32
    %c0_i32 = arith.constant 0 : i32
    %c0_i32_0 = arith.constant 0 : i32
    return %1, %c0_i32 : i32, i32
  }
  func.func @transform_1(%arg0: i32, %arg1: i32) -> (i32, i32) {
    %c1_i32 = arith.constant 1 : i32
    %0 = arith.muli %arg0, %c1_i32 : i32
    %1 = arith.addi %0, %arg1 : i32
    %c0_i32 = arith.constant 0 : i32
    %c0_i32_0 = arith.constant 0 : i32
    return %1, %c0_i32 : i32, i32
  }
  func.func @transform_2(%arg0: i32, %arg1: i32) -> (i32, i32) {
    %c0_i32 = arith.constant 0 : i32
    %c0_i32_0 = arith.constant 0 : i32
    return %arg0, %c0_i32 : i32, i32
  }
}

</mosaic_0001>

<bundles_post_ra>
// kernel: tpu_custom_call.1
= control target key start
LH: loop header
LB: loop body
LE: loop exit
PB: predicated region body
PF: predicated region fallthrough
CT: control target
= control target key end

     0   :  { %7 = vsyncpa [#allocation4], 0  ;;  %s283_s0 = inlined_call_operand.hbm [shape: f32[1,2048], index: 0, kind: input, shape index: {}]   ;;  %s284_s1 = inlined_call_operand.hbm [shape: f32[1,2048], index: 1, kind: input, shape index: {}]   ;;  %s285_s2 = inlined_call_operand.hbm [shape: f32[1,1], index: 2, kind: output, shape index: {}]  }
   0x1   :  { %8 = vsyncpa [#allocation7], 0 }
   0x2   :  { %9 = vsyncpa [#allocation5], 0  ;;  %s227_s9 = smov [#allocation3]   ;;  %s228_s11 = smov [#allocation6]  }
   0x3   :  { %s20_s10 = sshll.u32 %s227_s9, 4  ;;  %s34_s12 = sshll.u32 %s228_s11, 4  ;;  %s21_s10 = int_to_ptr.vmem [resolvable:$true] %s20_s10  ;;  %s35_s12 = int_to_ptr.vmem [resolvable:$true] %s34_s12 }
   0x4   :  { %s167_s15 = scalar_lea.hbm %s283_s0, 256 }
   0x5   :  { %p168_p0 = scmp.ne.s32.totalorder %s283_s0, %s167_s15  ;;  %p171_p1 = scmp.lt.u32.totalorder %s167_s15, %s283_s0 }
   0x7   :  { %p173_p2 = pnand %p171_p1, %p168_p0 }
   0x9   :  { %176 = shalt.err (!%p173_p2)
}
   0xa   :  { %s177_s20 = scalar_lea.vmem %s21_s10, 256  ;;  %p182_p4 = scmp.lt.s32.totalorder %s21_s10, %s21_s10 }
   0xb   :  { %p178_p3 = scmp.ne.s32.totalorder %s21_s10, %s177_s20  ;;  %p183_p5 = scmp.lt.s32.totalorder %s177_s20, %s177_s20 }
   0xd   :  { %p184_p6 = por %p183_p5, %p182_p4 }
   0xf   :  { %p185_p7 = pnand %p184_p6, %p178_p3 }
  0x11   :  { %188 = shalt.err (!%p185_p7)
}
  0x12   :  { %23 = dma.hbm_to_vmem [thread:$0]  %s283_s0, 256, %s21_s10, [#allocation4]  }
  0x13   :  { %s189_s25 = scalar_lea.hbm %s284_s1, 256 }
  0x14   :  { %p190_p8 = scmp.ne.s32.totalorder %s284_s1, %s189_s25  ;;  %p193_p9 = scmp.lt.u32.totalorder %s189_s25, %s284_s1 }
  0x16   :  { %p195_p10 = pnand %p193_p9, %p190_p8 }
  0x18   :  { %198 = shalt.err (!%p195_p10)
}
  0x19   :  { %s199_s30 = scalar_lea.vmem %s35_s12, 256  ;;  %p204_p12 = scmp.lt.s32.totalorder %s35_s12, %s35_s12 }
  0x1a   :  { %p200_p11 = scmp.ne.s32.totalorder %s35_s12, %s199_s30  ;;  %p205_p13 = scmp.lt.s32.totalorder %s199_s30, %s199_s30 }
  0x1c   :  { %p206_p0 = por %p205_p13, %p204_p12 }
  0x1e   :  { %p207_p1 = pnand %p206_p0, %p200_p11 }
  0x20   :  { %210 = shalt.err (!%p207_p1)
}
  0x21   :  { %37 = dma.hbm_to_vmem [thread:$0]  %s284_s1, 256, %s35_s12, [#allocation7]  }
  0x22   :  { %221 = dma.done.wait [#allocation4], 256  }
  0x23   :  { %222 = vsyncadd [#allocation4], 4294967040 }
  0x24   :  { %223 = dma.done.wait [#allocation7], 256  }
  0x25   :  { %224 = vsyncadd [#allocation7], 4294967040  ;;  %v229_v0 = vmov 0.0   ;;  %v66_v1 = vld [vmem:[#allocation3] sm:$0xff]  ;;  %v67_v2 = vld [vmem:[#allocation3 + $0x8] sm:$0xff]  ;;  %s211_s7 = scalar_lea.hbm %s285_s2, 16 }
  0x26   :  { %50 = vst [vmem:[#allocation2] sm:$0xff] %v229_v0  ;;  %51 = vst [vmem:[#allocation2 + $0x8] sm:$0xff] %v229_v0  ;;  %v68_v3 = vld [vmem:[#allocation6] sm:$0xff]  ;;  %v69_v4 = vld [vmem:[#allocation6 + $0x8] sm:$0xff]  ;;  %v230_v9 = vmov 0.3   ;;  %p212_p2 = scmp.ne.s32.totalorder %s285_s2, %s211_s7  ;;  %p215_p3 = scmp.lt.u32.totalorder %s211_s7, %s285_s2 }
  0x27   :  { %52 = vst [vmem:[#allocation2 + $0x10] sm:$0xff] %v229_v0  ;;  %53 = vst [vmem:[#allocation2 + $0x18] sm:$0xff] %v229_v0  ;;  %v70_v5 = vsub.f32 %v66_v1, %v68_v3  ;;  %vm72_vm0 = vcmp.ge.f32.partialorder %v68_v3, 0.5  ;;  %vm74_vm1 = vcmp.le.f32.partialorder %v68_v3, -0.5  ;;  %v71_v7 = vsub.f32 %v67_v2, %v69_v4 }
  0x28   :  { %54 = vst [vmem:[#allocation2 + $0x20] sm:$0xff] %v229_v0  ;;  %55 = vst [vmem:[#allocation2 + $0x28] sm:$0xff] %v229_v0  ;;  %vm73_vm2 = vcmp.ge.f32.partialorder %v69_v4, 0.5  ;;  %vm75_vm3 = vcmp.le.f32.partialorder %v69_v4, -0.5  ;;  %p217_p4 = pnand %p215_p3, %p212_p2 }
  0x29   :  { %56 = vst [vmem:[#allocation2 + $0x30] sm:$0xff] %v229_v0  ;;  %57 = vst [vmem:[#allocation2 + $0x38] sm:$0xff] %v229_v0 }
  0x2a   :  { %58 = vst [vmem:[#allocation2 + $0x40] sm:$0xff] %v229_v0  ;;  %59 = vst [vmem:[#allocation2 + $0x48] sm:$0xff] %v229_v0 }
  0x2b   :  { %60 = vst [vmem:[#allocation2 + $0x50] sm:$0xff] %v229_v0  ;;  %61 = vst [vmem:[#allocation2 + $0x58] sm:$0xff] %v229_v0 }
  0x2c   :  { %62 = vst [vmem:[#allocation2 + $0x60] sm:$0xff] %v229_v0  ;;  %63 = vst [vmem:[#allocation2 + $0x68] sm:$0xff] %v229_v0 }
  0x2d   :  { %64 = vst [vmem:[#allocation2 + $0x70] sm:$0xff] %v229_v0  ;;  %65 = vst [vmem:[#allocation2 + $0x78] sm:$0xff] %v229_v0 }
  0x2e   :  { %v84_v6 = vld [vmem:[#allocation2] ss:$8 sm:$0xf]  ;;  %vm76_vm4 = vmor %vm72_vm0, %vm74_vm1 }
  0x2f   :  { %vm77_vm5 = vmor %vm73_vm2, %vm75_vm3  ;;  %v78_v10 = vsel %vm76_vm4, 0.7, %v230_v9 }
  0x30   :  { %v85_v8 = vld [vmem:[#allocation2] ss:$8 sm:$0xf0]  ;;  %v79_v12 = vsel %vm77_vm5, 0.7, %v230_v9  ;;  %v80_v13 = vmul.f32 %v78_v10, %v70_v5 }
  0x31   :  { %v86_v14 = vor.u32 %v85_v8, %v84_v6  ;;  %v81_v16 = vmul.f32 %v79_v12, %v71_v7 }
  0x32   :  { %v88_v11 = vld [vmem:[#allocation2 + $0x40] ss:$8 sm:$0xf]  ;;  %v82_v18 = vmul.f32 %v80_v13, %v70_v5 }
  0x33   :  { %v83_v19 = vmul.f32 %v81_v16, %v71_v7 }
  0x34   :  { %v89_v15 = vld [vmem:[#allocation2 + $0x40] ss:$8 sm:$0xf0]  ;;  %v93_v20 = vadd.f32 %v86_v14, %v82_v18 }
  0x35   :  { %v90_v17 = vor.u32 %v89_v15, %v88_v11 }
  0x36   :  { %95 = vst [vmem:[#allocation2] ss:$8 sm:$0xf] %v93_v20  ;;  %96 = vst [vmem:[#allocation2] ss:$8 sm:$0xf0] %v93_v20 }
  0x37   :  { %v94_v21 = vadd.f32 %v90_v17, %v83_v19 }
  0x39   :  { %97 = vst [vmem:[#allocation2 + $0x40] ss:$8 sm:$0xf] %v94_v21  ;;  %98 = vst [vmem:[#allocation2 + $0x40] ss:$8 sm:$0xf0] %v94_v21 }
  0x3d   :  { %v102_v22 = vld [vmem:[#allocation2] sm:$0xff]  ;;  %v103_v23 = vld [vmem:[#allocation2 + $0x8] sm:$0xff]  ;;  %v104_v24 = vld [vmem:[#allocation2 + $0x10] sm:$0xff] }
  0x3e   :  { %v118_v25 = vadd.f32 %v103_v23, %v102_v22  ;;  %v105_v26 = vld [vmem:[#allocation2 + $0x18] sm:$0xff]  ;;  %v106_v28 = vld [vmem:[#allocation2 + $0x20] sm:$0xff]  ;;  %v107_v30 = vld [vmem:[#allocation2 + $0x28] sm:$0xff] }
  0x3f   :  { %v108_v32 = vld [vmem:[#allocation2 + $0x30] sm:$0xff]  ;;  %v109_v34 = vld [vmem:[#allocation2 + $0x38] sm:$0xff] }
  0x40   :  { %v119_v27 = vadd.f32 %v118_v25, %v104_v24  ;;  %v110_v36 = vld [vmem:[#allocation2 + $0x40] sm:$0xff]  ;;  %v111_v38 = vld [vmem:[#allocation2 + $0x48] sm:$0xff]  ;;  %v112_v40 = vld [vmem:[#allocation2 + $0x50] sm:$0xff] }
  0x41   :  { %v113_v42 = vld [vmem:[#allocation2 + $0x58] sm:$0xff]  ;;  %v114_v44 = vld [vmem:[#allocation2 + $0x60] sm:$0xff]  ;;  %v115_v46 = vld [vmem:[#allocation2 + $0x68] sm:$0xff] }
  0x42   :  { %v120_v29 = vadd.f32 %v119_v27, %v105_v26  ;;  %v116_v48 = vld [vmem:[#allocation2 + $0x70] sm:$0xff]  ;;  %v117_v50 = vld [vmem:[#allocation2 + $0x78] sm:$0xff] }
  0x44   :  { %v121_v31 = vadd.f32 %v120_v29, %v106_v28 }
  0x46   :  { %v122_v33 = vadd.f32 %v121_v31, %v107_v30 }
  0x48   :  { %v123_v35 = vadd.f32 %v122_v33, %v108_v32 }
  0x4a   :  { %v124_v37 = vadd.f32 %v123_v35, %v109_v34 }
  0x4c   :  { %v125_v39 = vadd.f32 %v124_v37, %v110_v36 }
  0x4e   :  { %v126_v41 = vadd.f32 %v125_v39, %v111_v38 }
  0x50   :  { %v127_v43 = vadd.f32 %v126_v41, %v112_v40 }
  0x52   :  { %v128_v45 = vadd.f32 %v127_v43, %v113_v42 }
  0x54   :  { %v129_v47 = vadd.f32 %v128_v45, %v114_v44 }
  0x56   :  { %v130_v49 = vadd.f32 %v129_v47, %v115_v46 }
  0x58   :  { %v131_v51 = vadd.f32 %v130_v49, %v116_v48 }
  0x5a   :  { %v132_v52 = vadd.f32 %v131_v51, %v117_v50 }
  0x5c   :  { %133 = vadd.xlane.f32.xlu0 %v132_v52 }
  0xe9   :  { %v134_v53 = vpop.xlane.xlu0 %133 }
  0xea   :  { %v135_v54 = vrot.slane %v134_v53, 4 }
  0xec   :  { %v136_v55 = vadd.f32 %v135_v54, %v134_v53 }
  0xee   :  { %v137_v56 = vrot.slane %v136_v55, 2 }
  0xf0   :  { %v138_v57 = vadd.f32 %v137_v56, %v136_v55 }
  0xf2   :  { %v139_v58 = vrot.slane %v138_v57, 1 }
  0xf4   :  { %v140_v59 = vadd.f32 %v139_v58, %v138_v57 }
  0xf6   :  { %160 = vpush %v140_v59 }
 0x127   :  { %s161_s1 = spop %160 }
 0x128   :  { %s142_s4 = smul.f32 0.5, %s161_s1 }
 0x12a   :  { %144 = sst [smem:[#allocation8]] %s142_s4 }
 0x12b   :  { %220 = shalt.err (!%p217_p4)
}
 0x12c   :  { %s231_s12 = smov [#allocation8]  }
 0x12d   :  { %152 = dma.smem_to_hbm %s231_s12, 16, %s285_s2, [#allocation5]  }
 0x12e   :  { %225 = dma.done.wait [#allocation5], 16  }
 0x12f   :  { %226 = vsyncadd [#allocation5], 4294967280 }
 0x130   :  { %156 = sfence }
 0x131   :  { %157 = vsyncpa [#allocation4], 1 }
 0x132   :  { %158 = vsyncpa [#allocation7], 1 }
 0x133   :  { %159 = vsyncpa [#allocation5], 1 }

</bundles_post_ra>
